<compile_context>
chip_gen: v7x
topology: tpu7x:2x2x1
jax: 0.10.0
libtpu: 0.0.40
codegen_flags: <defaults>
</compile_context>

<pallas_src>
import jax
import jax.numpy as jnp
from jax.experimental import pallas as pl
from jax.experimental.pallas import tpu as pltpu


def _round_up(n: int, m: int) -> int:
    return ((n + m - 1) // m) * m


def mlp_policy_kernel(x_ref, w1_ref, b1_ref, w2_ref, b2_ref, logp_ref):
    # fc1 + ReLU (f32 operands, f32 MXU accumulation).
    h = jnp.maximum(
        jnp.dot(x_ref[...], w1_ref[...], preferred_element_type=jnp.float32)
        + b1_ref[...],
        0.0,
    )

    # fc2 -> logits. Padded class lanes carry a -1e30 bias (set at prepare time)
    # so no in-kernel iota/where mask is needed.
    logits = (
        jnp.dot(h, w2_ref[...], preferred_element_type=jnp.float32) + b2_ref[...]
    )

    # Categorical(logits=...) normalization: log_probs = logits - logsumexp(logits).
    m = jnp.max(logits, axis=-1, keepdims=True)
    z = logits - m
    lse = jnp.log(jnp.sum(jnp.exp(z), axis=-1, keepdims=True))
    logp_ref[...] = z - lse


def prepare_policy_params(w1, b1, w2, b2):
    """One-time layout/padding of the MLP parameters (hoisted out of the forward).

    w1: [input_size, hidden]  (pre-transposed vs. PyTorch's [out, in])
    b1: [hidden]
    w2: [hidden, output]
    b2: [output]
    Returns (padded params tuple, num_actions).
    """
    IN, H = w1.shape
    O = w2.shape[1]
    H_p = _round_up(H, 128)
    O_p = _round_up(O, 128)

    w1p = jnp.zeros((IN, H_p), jnp.float32).at[:, :H].set(w1.astype(jnp.float32))
    b1p = jnp.zeros((1, H_p), jnp.float32).at[:, :H].set(
        jnp.asarray(b1, jnp.float32).reshape(1, H))
    w2p = jnp.zeros((H_p, O_p), jnp.float32).at[:H, :O].set(w2.astype(jnp.float32))
    # Padded class lanes get a huge negative bias -> they vanish from the softmax.
    b2p = jnp.full((1, O_p), -1e30, jnp.float32).at[:, :O].set(
        jnp.asarray(b2, jnp.float32).reshape(1, O))
    return (w1p, b1p, w2p, b2p), O


def mlp_policy_forward(x, prepared_params, num_actions, *, tile_b: int = 2048):
    """Returns the Categorical policy's normalized log-probabilities [B, num_actions].

    (Categorical(logits=raw).logits == log_probs, so this fully defines the
    distribution returned by the PyTorch module.)
    """
    w1p, b1p, w2p, b2p = prepared_params
    B, IN = x.shape
    IN_w, H_p = w1p.shape
    O_p = w2p.shape[1]
    assert IN == IN_w, "x feature dim must match w1"

    # Minimal batch padding: multiple of 8 sublanes (no feature-dim padding, no
    # full-tile blowup in HBM).
    B_pad = _round_up(B, 8)
    xp = x.astype(jnp.float32)
    if B_pad != B:
        xp = jnp.pad(xp, ((0, B_pad - B), (0, 0)))

    # Tile selection: as large as possible (amortize ~0.35us per-step overhead),
    # but split into >= 2 grid steps when the batch is big enough so both v7x
    # TensorCores get work (harmless on single-TC v5e/v6e).
    tb = min(tile_b, B_pad)
    tb = max(8, (tb // 8) * 8)
    if pl.cdiv(B_pad, tb) < 2 and B_pad >= 1024:
        tb = _round_up(pl.cdiv(B_pad, 2), 256)
    grid = (pl.cdiv(B_pad, tb),)

    # VMEM budget: double-buffered x tile + double-buffered output tile +
    # resident (double-buffered) params, with generous headroom.
    param_bytes = 4 * (w1p.size + b1p.size + w2p.size + b2p.size)
    resident = 2 * (tb * IN * 4) + 2 * (tb * O_p * 4) + 2 * param_bytes
    vmem_limit = int(min(64 << 20, max(8 << 20, 2 * resident + (2 << 20))))

    flops = 2 * B_pad * (IN * H_p + H_p * O_p)
    bytes_accessed = (xp.size * 4 + param_bytes + B_pad * O_p * 4)
    cost = pl.CostEstimate(flops=flops,
                           transcendentals=B_pad * (O_p + 1),
                           bytes_accessed=bytes_accessed)

    in_specs = [
        # x: tiled over the batch grid axis, full (unpadded) feature dim.
        pl.BlockSpec((tb, IN), lambda i: (i, 0)),
        # Weights/biases: same block every step -> VMEM-resident across the grid.
        pl.BlockSpec((IN, H_p), lambda i: (0, 0)),
        pl.BlockSpec((1, H_p), lambda i: (0, 0)),
        pl.BlockSpec((H_p, O_p), lambda i: (0, 0)),
        pl.BlockSpec((1, O_p), lambda i: (0, 0)),
    ]
    out_spec = pl.BlockSpec((tb, O_p), lambda i: (i, 0))

    logp_p = pl.pallas_call(
        mlp_policy_kernel,
        out_shape=jax.ShapeDtypeStruct((B_pad, O_p), jnp.float32),
        grid=grid,
        in_specs=in_specs,
        out_specs=out_spec,
        compiler_params=pltpu.CompilerParams(
            dimension_semantics=("parallel",),
            vmem_limit_bytes=vmem_limit,
        ),
        cost_estimate=cost,
    )(xp, w1p, b1p, w2p, b2p)

    # Strip batch padding and padded class lanes.
    return logp_p[:B, :num_actions]


def init_params(key, input_size, output_size, hidden_size=128):
    """Deterministic init mirroring torch.nn.Linear's U(-1/sqrt(fan_in), 1/sqrt(fan_in))."""
    k1, k2, k3, k4 = jax.random.split(key, 4)
    bound1 = 1.0 / (input_size ** 0.5)
    bound2 = 1.0 / (hidden_size ** 0.5)
    # stored as [in, out] (pre-transposed relative to PyTorch's [out, in])
    w1 = jax.random.uniform(k1, (input_size, hidden_size), jnp.float32, -bound1, bound1)
    b1 = jax.random.uniform(k2, (hidden_size,), jnp.float32, -bound1, bound1)
    w2 = jax.random.uniform(k3, (hidden_size, output_size), jnp.float32, -bound2, bound2)
    b2 = jax.random.uniform(k4, (output_size,), jnp.float32, -bound2, bound2)
    return w1, b1, w2, b2


if __name__ == "__main__":
    batch = 2
    input_size = 16
    hidden_size = 128   # module default
    output_size = 8

    key = jax.random.PRNGKey(0)
    kx, kp = jax.random.split(key)
    x = jax.random.normal(kx, (batch, input_size), dtype=jnp.float32)
    w1, b1, w2, b2 = init_params(kp, input_size, output_size, hidden_size)

    # Parameter padding/layout is done once, outside the per-call forward path.
    prepared, num_actions = prepare_policy_params(w1, b1, w2, b2)

    log_probs = mlp_policy_forward(x, prepared, num_actions)
    jax.block_until_ready(log_probs)

    # Pure-JAX f32 reference of the same forward.
    h_ref = jnp.maximum(x @ w1 + b1[None, :], 0.0)
    logits_ref = h_ref @ w2 + b2[None, :]
    logp_ref = jax.nn.log_softmax(logits_ref, axis=-1)

    assert log_probs.shape == (batch, output_size)
    assert jnp.allclose(log_probs, logp_ref, atol=1e-3, rtol=1e-3)
    # Categorical log-probs must normalize: sum(exp(log_probs)) == 1 per row.
    assert jnp.allclose(jnp.sum(jnp.exp(log_probs), axis=-1), 1.0, atol=1e-5)

    # TODO(synk): sampling / entropy of the Categorical are left to the caller
    # (jax.random.categorical(key, log_probs) reproduces dist.sample()).
    print("KERNEL_OK")
</pallas_src>

<mosaic_0001>
module attributes {stable_mosaic.version = 11 : i64} {
  func.func @mlp_policy_kernel(%arg0: i32, %arg1: memref<8x16xf32, #tpu.memory_space<vmem>>, %arg2: memref<16x128xf32, #tpu.memory_space<vmem>>, %arg3: memref<1x128xf32, #tpu.memory_space<vmem>>, %arg4: memref<128x128xf32, #tpu.memory_space<vmem>>, %arg5: memref<1x128xf32, #tpu.memory_space<vmem>>, %arg6: memref<8x128xf32, #tpu.memory_space<vmem>>) attributes {dimension_semantics = [#tpu.dimension_semantics<parallel>], iteration_bounds = array<i64: 1>, scalar_prefetch = 0 : i64, scratch_operands = 0 : i64, tpu.core_type = #tpu.core_type<tc>, window_params = [{transform_indices = @transform_0, window_bounds = array<i64: 8, 16>}, {pipeline_mode = #tpu.pipeline_mode<synchronous>, transform_indices = @transform_1, window_bounds = array<i64: 16, 128>}, {pipeline_mode = #tpu.pipeline_mode<synchronous>, transform_indices = @transform_2, window_bounds = array<i64: 1, 128>}, {pipeline_mode = #tpu.pipeline_mode<synchronous>, transform_indices = @transform_3, window_bounds = array<i64: 128, 128>}, {pipeline_mode = #tpu.pipeline_mode<synchronous>, transform_indices = @transform_4, window_bounds = array<i64: 1, 128>}, {transform_indices = @transform_5, window_bounds = array<i64: 8, 128>}]} {
    %c0 = arith.constant 0 : index
    %c0_0 = arith.constant 0 : index
    %0 = vector.load %arg1[%c0, %c0_0] : memref<8x16xf32, #tpu.memory_space<vmem>>, vector<8x16xf32>
    %c0_1 = arith.constant 0 : index
    %c0_2 = arith.constant 0 : index
    %1 = vector.load %arg2[%c0_1, %c0_2] : memref<16x128xf32, #tpu.memory_space<vmem>>, vector<16x128xf32>
    %cst = arith.constant dense<0.000000e+00> : vector<8x128xf32>
    %2 = tpu.matmul %0, %1, %cst {dimension_numbers = #tpu.dot_dimension_numbers<[1], [0], [0], [1], [0, 0, 1, 1], [], []>} : vector<8x16xf32>, vector<16x128xf32>, vector<8x128xf32> -> vector<8x128xf32>
    %c0_3 = arith.constant 0 : index
    %c0_4 = arith.constant 0 : index
    %3 = vector.load %arg3[%c0_3, %c0_4] : memref<1x128xf32, #tpu.memory_space<vmem>>, vector<1x128xf32>
    %4 = vector.broadcast %3 : vector<1x128xf32> to vector<8x128xf32>
    %5 = arith.addf %2, %4 : vector<8x128xf32>
    %cst_5 = arith.constant 0.000000e+00 : f32
    %6 = vector.broadcast %cst_5 : f32 to vector<8x128xf32>
    %7 = arith.maximumf %5, %6 : vector<8x128xf32>
    %c0_6 = arith.constant 0 : index
    %c0_7 = arith.constant 0 : index
    %8 = vector.load %arg4[%c0_6, %c0_7] : memref<128x128xf32, #tpu.memory_space<vmem>>, vector<128x128xf32>
    %cst_8 = arith.constant dense<0.000000e+00> : vector<8x128xf32>
    %9 = tpu.matmul %7, %8, %cst_8 {dimension_numbers = #tpu.dot_dimension_numbers<[1], [0], [0], [1], [0, 0, 1, 1], [], []>} : vector<8x128xf32>, vector<128x128xf32>, vector<8x128xf32> -> vector<8x128xf32>
    %c0_9 = arith.constant 0 : index
    %c0_10 = arith.constant 0 : index
    %10 = vector.load %arg5[%c0_9, %c0_10] : memref<1x128xf32, #tpu.memory_space<vmem>>, vector<1x128xf32>
    %11 = vector.broadcast %10 : vector<1x128xf32> to vector<8x128xf32>
    %12 = arith.addf %9, %11 : vector<8x128xf32>
    %cst_11 = arith.constant dense<0xFF800000> : vector<8xf32>
    %13 = vector.multi_reduction <maximumf>, %12, %cst_11 [1] : vector<8x128xf32> to vector<8xf32>
    %14 = vector.shape_cast %13 : vector<8xf32> to vector<8x1xf32>
    %15 = vector.broadcast %14 : vector<8x1xf32> to vector<8x128xf32>
    %16 = arith.subf %12, %15 : vector<8x128xf32>
    %17 = math.exp %16 : vector<8x128xf32>
    %cst_12 = arith.constant dense<0.000000e+00> : vector<8xf32>
    %18 = vector.multi_reduction <add>, %17, %cst_12 [1] : vector<8x128xf32> to vector<8xf32>
    %19 = vector.shape_cast %18 : vector<8xf32> to vector<8x1xf32>
    %20 = math.log %19 : vector<8x1xf32>
    %21 = vector.broadcast %20 : vector<8x1xf32> to vector<8x128xf32>
    %22 = arith.subf %16, %21 : vector<8x128xf32>
    %c0_13 = arith.constant 0 : index
    %c0_14 = arith.constant 0 : index
    %23 = vector.load %arg6[%c0_13, %c0_14] : memref<8x128xf32, #tpu.memory_space<vmem>>, vector<8x128xf32>
    tpu.vector_store %arg6[%c0_13, %c0_14], %22 {strides = array<i32>} : memref<8x128xf32, #tpu.memory_space<vmem>>, vector<8x128xf32>,
    return
  }
  func.func @transform_0(%arg0: i32) -> (i32, i32) {
    %c0_i32 = arith.constant 0 : i32
    %c0_i32_0 = arith.constant 0 : i32
    return %arg0, %c0_i32 : i32, i32
  }
  func.func @transform_1(%arg0: i32) -> (i32, i32) {
    %c0_i32 = arith.constant 0 : i32
    %c0_i32_0 = arith.constant 0 : i32
    %c0_i32_1 = arith.constant 0 : i32
    return %c0_i32, %c0_i32_0 : i32, i32
  }
  func.func @transform_2(%arg0: i32) -> (i32, i32) {
    %c0_i32 = arith.constant 0 : i32
    %c0_i32_0 = arith.constant 0 : i32
    %c0_i32_1 = arith.constant 0 : i32
    return %c0_i32, %c0_i32_0 : i32, i32
  }
  func.func @transform_3(%arg0: i32) -> (i32, i32) {
    %c0_i32 = arith.constant 0 : i32
    %c0_i32_0 = arith.constant 0 : i32
    %c0_i32_1 = arith.constant 0 : i32
    return %c0_i32, %c0_i32_0 : i32, i32
  }
  func.func @transform_4(%arg0: i32) -> (i32, i32) {
    %c0_i32 = arith.constant 0 : i32
    %c0_i32_0 = arith.constant 0 : i32
    %c0_i32_1 = arith.constant 0 : i32
    return %c0_i32, %c0_i32_0 : i32, i32
  }
  func.func @transform_5(%arg0: i32) -> (i32, i32) {
    %c0_i32 = arith.constant 0 : i32
    %c0_i32_0 = arith.constant 0 : i32
    return %arg0, %c0_i32 : i32, i32
  }
}

</mosaic_0001>

<bundles_post_ra>
// kernel: tpu_custom_call.1
= control target key start
LH: loop header
LB: loop body
LE: loop exit
PB: predicated region body
PF: predicated region fallthrough
CT: control target
= control target key end

     0   :  { %10 = vsyncpa [#allocation3], 0  ;;  %s563_s0 = inlined_call_operand.hbm [shape: f32[8,16], index: 0, kind: input, shape index: {}]   ;;  %s564_s1 = inlined_call_operand.hbm [shape: f32[16,128], index: 1, kind: input, shape index: {}]   ;;  %s565_s2 = inlined_call_operand.vmem [shape: f32[1,128], index: 2, kind: input, shape index: {}]   ;;  %s566_s3 = inlined_call_operand.hbm [shape: f32[128,128], index: 3, kind: input, shape index: {}]   ;;  %s567_s4 = inlined_call_operand.vmem [shape: f32[1,128], index: 4, kind: input, shape index: {}]   ;;  %s568_s5 = inlined_call_operand.hbm [shape: f32[8,128], index: 5, kind: output, shape index: {}]  }
   0x1   :  { %11 = vsyncpa [#allocation6], 0 }
   0x2   :  { %12 = vsyncpa [#allocation4], 0  ;;  %s464_s18 = smov [#allocation5]   ;;  %s370_s22 = scalar_lea.hbm %s564_s1, 256 }
   0x3   :  { %s28_s19 = sshll.u32 %s464_s18, 4  ;;  %p371_p0 = scmp.ne.s32.totalorder %s564_s1, %s370_s22  ;;  %s29_s19 = int_to_ptr.vmem [resolvable:$true] %s28_s19 }
   0x4   :  { %p374_p1 = scmp.lt.u32.totalorder %s370_s22, %s564_s1 }
   0x6   :  { %p376_p2 = pnand %p374_p1, %p371_p0 }
   0x8   :  { %379 = shalt.err (!%p376_p2)
}
   0x9   :  { %s380_s27 = scalar_lea.vmem %s29_s19, 256  ;;  %p385_p4 = scmp.lt.s32.totalorder %s29_s19, %s29_s19 }
   0xa   :  { %p381_p3 = scmp.ne.s32.totalorder %s29_s19, %s380_s27  ;;  %p386_p5 = scmp.lt.s32.totalorder %s380_s27, %s380_s27 }
   0xc   :  { %p387_p6 = por %p386_p5, %p385_p4 }
   0xe   :  { %p388_p7 = pnand %p387_p6, %p381_p3 }
  0x10   :  { %391 = shalt.err (!%p388_p7)
}
  0x11   :  { %s465_s28 = smov 128   ;;  %s466_s29 = smov 8  }
  0x12   :  { %34 = dma.hbm_to_vmem [thread:$0]  %s564_s1, 256, %s29_s19, [#allocation6], %s465_s28, %s465_s28, %s466_s29  }
  0x13   :  { %s467_s7 = smov [#allocation2]   ;;  %s468_s9 = smov [#allocation7]  }
  0x14   :  { %s19_s8 = sshll.u32 %s467_s7, 4  ;;  %s42_s10 = sshll.u32 %s468_s9, 4  ;;  %s20_s8 = int_to_ptr.vmem [resolvable:$true] %s19_s8  ;;  %s43_s10 = int_to_ptr.vmem [resolvable:$true] %s42_s10 }
  0x15   :  { %s392_s13 = scalar_lea.hbm %s563_s0, 128 }
  0x16   :  { %p393_p8 = scmp.ne.s32.totalorder %s563_s0, %s392_s13  ;;  %p396_p9 = scmp.lt.u32.totalorder %s392_s13, %s563_s0 }
  0x18   :  { %p398_p10 = pnand %p396_p9, %p393_p8 }
  0x1a   :  { %401 = shalt.err (!%p398_p10)
}
  0x1b   :  { %s402_s1 = scalar_lea.vmem %s20_s8, 128  ;;  %p407_p12 = scmp.lt.s32.totalorder %s20_s8, %s20_s8 }
  0x1c   :  { %p403_p11 = scmp.ne.s32.totalorder %s20_s8, %s402_s1  ;;  %p408_p13 = scmp.lt.s32.totalorder %s402_s1, %s402_s1 }
  0x1e   :  { %p409_p0 = por %p408_p13, %p407_p12 }
  0x20   :  { %p410_p1 = pnand %p409_p0, %p403_p11 }
  0x22   :  { %413 = shalt.err (!%p410_p1)
}
  0x23   :  { %22 = dma.hbm_to_vmem [thread:$0]  %s563_s0, 128, %s20_s8, [#allocation3]  }
  0x24   :  { %s414_s22 = scalar_lea.hbm %s566_s3, 2048 }
  0x25   :  { %p415_p2 = scmp.ne.s32.totalorder %s566_s3, %s414_s22  ;;  %p418_p3 = scmp.lt.u32.totalorder %s414_s22, %s566_s3 }
  0x27   :  { %p420_p4 = pnand %p418_p3, %p415_p2 }
  0x29   :  { %423 = shalt.err (!%p420_p4)
}
  0x2a   :  { %s424_s27 = scalar_lea.vmem %s43_s10, 2048  ;;  %p429_p6 = scmp.lt.s32.totalorder %s43_s10, %s43_s10 }
  0x2b   :  { %p425_p5 = scmp.ne.s32.totalorder %s43_s10, %s424_s27  ;;  %p430_p7 = scmp.lt.s32.totalorder %s424_s27, %s424_s27 }
  0x2d   :  { %p431_p8 = por %p430_p7, %p429_p6 }
  0x2f   :  { %p432_p9 = pnand %p431_p8, %p425_p5 }
  0x31   :  { %435 = shalt.err (!%p432_p9)
}
  0x32   :  { %48 = dma.hbm_to_vmem [thread:$0]  %s566_s3, 2048, %s43_s10, [#allocation6], %s465_s28, %s465_s28, %s466_s29  }
  0x33   :  { %458 = dma.done.wait [#allocation3], 128  }
  0x34   :  { %459 = vsyncadd [#allocation3], 4294967168 }
  0x35   :  { %460 = dma.done.wait [#allocation6], 2304  }
  0x36   :  { %461 = vsyncadd [#allocation6], 4294964992  ;;  %v469_v0 = vmov 0.0|0.0   ;;  %vm470_vm0 = vmmov 0   ;;  %v471_v1 = vmov 0.0   ;;  %v61_v2 = vld [vmem:[#allocation5] sm:$0xff] }
  0x37   :  { %330 = vmatprep.subr.bf16.mxu0 %v469_v0  ;;  %292 = vmatprep.mubr.msk.f32.mxu0 %vm470_vm0, %v471_v1  ;;  %v62_v3 = vld [vmem:[#allocation5 + $0x8] sm:$0xff]  ;;  %v145_v5 = vld [vmem:[#allocation7] sm:$0xff]  ;;  %v146_v6 = vld [vmem:[#allocation7 + $0x8] sm:$0xff]  ;;  %vm70_vm1 = vcmask 130048  }
  0x38   :  { %333 = vmatprep.subr.bf16.mxu1 %v469_v0  ;;  %327 = vmatprep.mubr.msk.f32.mxu1 %vm470_vm0, %v471_v1  ;;  %v331_v4 = vpack.c.bf16 %v62_v3, %v61_v2  ;;  %v147_v7 = vld [vmem:[#allocation7 + $0x10] sm:$0xff]  ;;  %v334_v8 = vpack.c.bf16 %v146_v6, %v145_v5  ;;  %v148_v9 = vld [vmem:[#allocation7 + $0x18] sm:$0xff]  ;;  %v60_v10 = vld [vmem:[#allocation2] sm:$0xff] }
  0x39   :  { %v337_v11 = vpack.c.bf16 %v148_v9, %v147_v7  ;;  %v149_v12 = vld [vmem:[#allocation7 + $0x20] sm:$0xff]  ;;  %v150_v13 = vld [vmem:[#allocation7 + $0x28] sm:$0xff]  ;;  %v151_v15 = vld [vmem:[#allocation7 + $0x30] sm:$0xff] }
  0x3a   :  { %332 = vmatpush3.bf16.msra.mxu0 %v331_v4  ;;  %335 = vmatpush3.bf16.msra.mxu1 %v334_v8  ;;  %v340_v14 = vpack.c.bf16 %v150_v13, %v149_v12  ;;  %v152_v16 = vld [vmem:[#allocation7 + $0x38] sm:$0xff]  ;;  %v153_v18 = vld [vmem:[#allocation7 + $0x40] sm:$0xff]  ;;  %v154_v19 = vld [vmem:[#allocation7 + $0x48] sm:$0xff] }
  0x3b   :  { %336 = vmatprep.subr.bf16.mxu1 %v469_v0  ;;  %v343_v17 = vpack.c.bf16 %v152_v16, %v151_v15  ;;  %v346_v20 = vpack.c.bf16 %v154_v19, %v153_v18  ;;  %v155_v21 = vld [vmem:[#allocation7 + $0x50] sm:$0xff]  ;;  %v156_v22 = vld [vmem:[#allocation7 + $0x58] sm:$0xff]  ;;  %v157_v24 = vld [vmem:[#allocation7 + $0x60] sm:$0xff] }
  0x3c   :  { %v349_v23 = vpack.c.bf16 %v156_v22, %v155_v21  ;;  %v158_v25 = vld [vmem:[#allocation7 + $0x68] sm:$0xff]  ;;  %v159_v27 = vld [vmem:[#allocation7 + $0x70] sm:$0xff]  ;;  %v160_v28 = vld [vmem:[#allocation7 + $0x78] sm:$0xff] }
  0x3d   :  { %293 = vmatmul.mubr.msk.f32.vlgmr.msra.gmra.mrb[0].mxu0 %vm70_vm1, %v60_v10  ;;  %v352_v26 = vpack.c.bf16 %v158_v25, %v157_v24  ;;  %v355_v29 = vpack.c.bf16 %v160_v28, %v159_v27  ;;  %v265_v30 = vld [vmem:[%s565_s2] ss:$0 sm:$0xff]  ;;  %s472_s2 = smov [#allocation8]  }
  0x3e   :  { %338 = vmatpush3.bf16.msra.mxu1 %v337_v11  ;;  %v267_v35 = vld [vmem:[%s567_s4] ss:$0 sm:$0xff]  ;;  %s255_s7 = sshll.u32 %s472_s2, 4  ;;  %s256_s7 = int_to_ptr.vmem [resolvable:$true] %s255_s7 }
  0x3f   :  { %339 = vmatprep.subr.bf16.mxu1 %v469_v0  ;;  %s436_s4 = scalar_lea.vmem %s256_s7, 128  ;;  %p441_p11 = scmp.lt.s32.totalorder %s256_s7, %s256_s7 }
  0x40   :  { %p437_p10 = scmp.ne.s32.totalorder %s256_s7, %s436_s4  ;;  %p442_p12 = scmp.lt.s32.totalorder %s436_s4, %s436_s4 }
  0x42   :  { %341 = vmatpush3.bf16.msra.mxu1 %v340_v14  ;;  %p443_p13 = por %p442_p12, %p441_p11 }
  0x43   :  { %342 = vmatprep.subr.bf16.mxu1 %v469_v0 }
  0x44   :  { %p444_p0 = pnand %p443_p13, %p437_p10 }
  0x46   :  { %344 = vmatpush3.bf16.msra.mxu1 %v343_v17 }
  0x47   :  { %345 = vmatprep.subr.bf16.mxu1 %v469_v0 }
  0x4a   :  { %347 = vmatpush3.bf16.msra.mxu1 %v346_v20 }
  0x4b   :  { %348 = vmatprep.subr.bf16.mxu1 %v469_v0 }
  0x4e   :  { %350 = vmatpush3.bf16.msra.mxu1 %v349_v23 }
  0x4f   :  { %351 = vmatprep.subr.bf16.mxu1 %v469_v0 }
  0x52   :  { %353 = vmatpush3.bf16.msra.mxu1 %v352_v26 }
  0x53   :  { %354 = vmatprep.subr.bf16.mxu1 %v469_v0 }
  0x56   :  { %356 = vmatpush3.bf16.msra.mxu1 %v355_v29 }
 0x110   :  { %v140_v31 = vpop.f32.mrb[0].mxu0 }
 0x111   :  { %v141_v32 = vadd.f32 %v265_v30, %v140_v31  ;;  %v294_v33 = vpop.f32.mrb[1].mxu0 }
 0x113   :  { %v144_v34 = vmax.f32 %v141_v32, 0.0 }
 0x115   :  { %328 = vmatmul.mubr.f32.vlgmr.msra.gmra.mrb[0].mxu1 %v144_v34 }
 0x1e8   :  { %v234_v36 = vpop.f32.mrb[0].mxu1 }
 0x1e9   :  { %v235_v37 = vadd.f32 %v267_v35, %v234_v36  ;;  %v329_v38 = vpop.f32.mrb[1].mxu1 }
 0x1eb   :  { %238 = vmax.xlane.f32.xlu0 %v235_v37 }
 0x278   :  { %v239_v39 = vpop.xlane.xlu0 %238 }
 0x279   :  { %v240_v40 = vsub.f32 %v235_v37, %v239_v39 }
 0x27b   :  { %v241_v41 = vmul.f32 1.442695, %v240_v40 }
 0x27d   :  { %366 = vpow2.f32 %v241_v41 }
 0x287   :  { %v367_v42 = vpop.eup %366 }
 0x288   :  { %243 = vadd.xlane.f32.xlu0 %v367_v42 }
 0x315   :  { %v244_v43 = vpop.xlane.xlu0 %243 }
 0x316   :  { %368 = vlog2.f32 %v244_v43 }
 0x320   :  { %v369_v44 = vpop.eup %368 }
 0x321   :  { %v246_v45 = vmul.f32 0.6931472, %v369_v44 }
 0x323   :  { %v247_v46 = vsub.f32 %v240_v40, %v246_v45 }
 0x325   :  { %248 = vst [vmem:[#allocation8] sm:$0xff] %v247_v46 }
 0x326   :  { %447 = shalt.err (!%p444_p0)
}
 0x327   :  { %s448_s10 = scalar_lea.hbm %s568_s5, 128 }
 0x328   :  { %p449_p1 = scmp.ne.s32.totalorder %s568_s5, %s448_s10  ;;  %p452_p2 = scmp.lt.u32.totalorder %s448_s10, %s568_s5 }
 0x32a   :  { %p454_p3 = pnand %p452_p2, %p449_p1 }
 0x32c   :  { %457 = shalt.err (!%p454_p3)
}
 0x32d   :  { %258 = dma.vmem_to_hbm [thread:$0]  %s256_s7, 128, %s568_s5, [#allocation4]  }
 0x32e   :  { %462 = dma.done.wait [#allocation4], 128  }
 0x32f   :  { %463 = vsyncadd [#allocation4], 4294967168 }
 0x330   :  { %262 = vsyncpa [#allocation3], 1 }
 0x331   :  { %263 = vsyncpa [#allocation6], 1 }
 0x332   :  { %264 = vsyncpa [#allocation4], 1 }

</bundles_post_ra>
